<compile_context>
chip_gen: v6e
topology: v6e:2x2x1
jax: 0.10.0
libtpu: 0.0.40
codegen_flags: <defaults>
</compile_context>

<pallas_src>
import functools

import jax
import jax.numpy as jnp
from jax.experimental import pallas as pl
from jax.experimental.pallas import tpu as pltpu


# ----------------------------------------------------------------------------
# Helpers
# ----------------------------------------------------------------------------
_LANE = 128        # lane width
_SUBLANE = 16      # bf16 sublane packing (covers f32's 8 as well)
_TM_CAP = 256      # max rows per M tile
_FULL_K_LIMIT = 4096   # single K step (no accumulator) up to this padded K


def _round_up(x, m):
    return (x + m - 1) // m * m


def _pick_tm(M, cap=_TM_CAP):
    """Return (Mp, tm) with Mp % tm == 0, tm <= cap, minimal M padding."""
    mp0 = _round_up(max(M, 1), _SUBLANE)
    nsteps = pl.cdiv(mp0, cap)
    tm = _round_up(pl.cdiv(mp0, nsteps), _SUBLANE)
    return nsteps * tm, tm


def _pick_tn(Np):
    """Prefer >= 2 lane-dense N tiles (lets the 'parallel' N axis shard across the
    2 TensorCores on v7x) while keeping tiles large (<= 1024)."""
    for cand in (1024, 512, 256):
        if Np % cand == 0 and Np // cand >= 2:
            return cand
    return Np  # single full-N tile (small layers)


def _pick_tk_loop(Kp):
    for cand in (2048, 1024, 512, 256, 128):
        if Kp % cand == 0:
            return cand
    return Kp


def _apply_act(y, act):
    if act == "lrelu":
        return jnp.maximum(y, 0.2 * y)       # LeakyReLU(0.2): 1 mul + 1 max
    if act == "relu":
        return jnp.maximum(y, 0.0)
    return y


# ----------------------------------------------------------------------------
# Kernels
# ----------------------------------------------------------------------------
def _linear_act_fullk_kernel(x_ref, w_ref, b_ref, o_ref, *, act):
    # Whole contraction in one MXU dot (bf16 operands, f32 accumulate),
    # bias + activation fused into the store epilogue. No scratch, no pl.when.
    y = jnp.dot(x_ref[...], w_ref[...], preferred_element_type=jnp.float32)
    y = y + b_ref[...]
    o_ref[...] = _apply_act(y, act).astype(o_ref.dtype)


def _linear_act_kloop_kernel(x_ref, w_ref, b_ref, o_ref, acc_ref, *, act):
    # Fallback for very large K: f32 accumulator in VMEM, init/finalize on K axis.
    k = pl.program_id(2)

    @pl.when(k == 0)
    def _():
        acc_ref[...] = jnp.zeros_like(acc_ref)

    acc_ref[...] += jnp.dot(x_ref[...], w_ref[...],
                            preferred_element_type=jnp.float32)

    @pl.when(k == pl.num_programs(2) - 1)
    def _():
        y = acc_ref[...] + b_ref[...]
        o_ref[...] = _apply_act(y, act).astype(o_ref.dtype)


# ----------------------------------------------------------------------------
# Fused Linear(+bias)+activation wrapper
# ----------------------------------------------------------------------------
def linear_act(x, w_bf16, bias_row, act, out_dtype=jnp.float32):
    """act(x @ w + b) with bf16 operands on the MXU and f32 accumulation.

    x:        (M, K)   float (cast to bf16); padded in here only if needed.
    w_bf16:   (Kp, Np) bf16, pre-padded to multiples of 128 (prepare_params).
    bias_row: (1, Np)  f32, pre-padded.
    Returns the *padded* (Mp, Np) result in out_dtype; caller slices.
    """
    M, K = x.shape
    Kp, Np = w_bf16.shape
    assert Kp % _LANE == 0 and Np % _LANE == 0 and K <= Kp
    assert bias_row.shape == (1, Np)

    Mp, tm = _pick_tm(M)
    tn = _pick_tn(Np)

    xp = x.astype(jnp.bfloat16)
    if (Mp, Kp) != (M, K):               # no-op for already-padded chained layers
        xp = jnp.pad(xp, ((0, Mp - M), (0, Kp - K)))

    out_bytes = jnp.dtype(out_dtype).itemsize

    if Kp <= _FULL_K_LIMIT:
        tk = Kp
        grid = (Mp // tm, Np // tn)
        kernel = functools.partial(_linear_act_fullk_kernel, act=act)
        in_specs = [
            pl.BlockSpec((tm, tk), lambda i, j: (i, 0)),
            pl.BlockSpec((tk, tn), lambda i, j: (0, j)),
            pl.BlockSpec((1, tn), lambda i, j: (0, j)),
        ]
        out_specs = pl.BlockSpec((tm, tn), lambda i, j: (i, j))
        scratch_shapes = []
        semantics = ("parallel", "parallel")
    else:
        tk = _pick_tk_loop(Kp)
        grid = (Mp // tm, Np // tn, Kp // tk)
        kernel = functools.partial(_linear_act_kloop_kernel, act=act)
        in_specs = [
            pl.BlockSpec((tm, tk), lambda i, j, k: (i, k)),
            pl.BlockSpec((tk, tn), lambda i, j, k: (k, j)),
            pl.BlockSpec((1, tn), lambda i, j, k: (0, j)),
        ]
        out_specs = pl.BlockSpec((tm, tn), lambda i, j, k: (i, j))
        scratch_shapes = [pltpu.VMEM((tm, tn), jnp.float32)]
        semantics = ("parallel", "parallel", "arbitrary")

    # VMEM budget: double-buffered tiles (+ f32 scratch) with 25% headroom,
    # clamped to stay comfortably inside v7x's 64 MiB physical VMEM.
    need = 2 * (tm * tk * 2 + tk * tn * 2 + tn * 4 + tm * tn * out_bytes) + tm * tn * 4
    vmem_limit = int(min(100 * 2**20, max(32 * 2**20, need * 5 // 4)))

    cost = pl.CostEstimate(
        flops=2 * Mp * Np * Kp,
        transcendentals=0,
        bytes_accessed=((Np // tn) * Mp * Kp * 2
                        + (Mp // tm) * Kp * Np * 2
                        + Mp * Np * out_bytes
                        + Np * 4),
    )

    return pl.pallas_call(
        kernel,
        out_shape=jax.ShapeDtypeStruct((Mp, Np), out_dtype),
        grid_spec=pltpu.PrefetchScalarGridSpec(
            num_scalar_prefetch=0,
            grid=grid,
            in_specs=in_specs,
            out_specs=out_specs,
            scratch_shapes=scratch_shapes,
        ),
        compiler_params=pltpu.CompilerParams(
            dimension_semantics=semantics,
            vmem_limit_bytes=vmem_limit,
        ),
        cost_estimate=cost,
    )(xp, w_bf16, bias_row)


# ----------------------------------------------------------------------------
# Parameter packing (done once, outside the jitted forward)
# ----------------------------------------------------------------------------
def prepare_params(torch_layout_params):
    """torch_layout_params: list of (weight (out, in) f32, bias (out,) f32).

    Pre-transposes to (in, out), pre-casts to bf16, and pre-pads both dims to
    lane multiples (128), so no weight/bias padding ever runs per forward call.
    """
    packed = []
    for w, b in torch_layout_params:
        w = jnp.asarray(w, jnp.float32).T                  # (in, out)
        K, N = w.shape
        Kp, Np = _round_up(K, _LANE), _round_up(N, _LANE)
        w = jnp.pad(w, ((0, Kp - K), (0, Np - N))).astype(jnp.bfloat16)
        b = jnp.pad(jnp.asarray(b, jnp.float32).reshape(1, N),
                    ((0, 0), (0, Np - N)))
        packed.append((w, b))
    return tuple(packed)


# ----------------------------------------------------------------------------
# Generator forward (matches the PyTorch module)
# ----------------------------------------------------------------------------
@functools.partial(jax.jit, static_argnames=("feat_dim", "norm"))
def generator_forward(z, label, params, feat_dim, norm=False):
    (w1, b1), (w2, b2), (w3, b3) = params
    M = z.shape[0]
    # One bf16 cast of the concatenated input; activations stay bf16 (padded)
    # between layers and are sliced back only at the very end.
    x = jnp.concatenate([z, label], axis=1).astype(jnp.bfloat16)
    x = linear_act(x, w1, b1, act="lrelu", out_dtype=jnp.bfloat16)
    x = linear_act(x, w2, b2, act="lrelu", out_dtype=jnp.bfloat16)
    x = linear_act(x, w3, b3, act="relu", out_dtype=jnp.float32)
    x = x[:M, :feat_dim]
    if norm:
        # F.normalize(img): trivial per-row L2 normalize, plain JAX.
        x = x / jnp.maximum(jnp.linalg.norm(x, axis=1, keepdims=True), 1e-12)
    return x


# ----------------------------------------------------------------------------
# Pure-JAX reference (same bf16-operand / f32-accumulate / bf16-intermediate math)
# ----------------------------------------------------------------------------
def reference_forward(z, label, torch_layout_params, norm=False):
    (w1, b1), (w2, b2), (w3, b3) = torch_layout_params

    def lin(x, w, b):
        w = jnp.asarray(w, jnp.float32).T.astype(jnp.bfloat16)
        return jnp.dot(x.astype(jnp.bfloat16), w,
                       preferred_element_type=jnp.float32) + jnp.asarray(b, jnp.float32)

    x = jnp.concatenate([z, label], axis=1)
    x = jnp.maximum(lin(x, w1, b1), 0.2 * lin(x, w1, b1)).astype(jnp.bfloat16)
    x = jnp.maximum(lin(x, w2, b2), 0.2 * lin(x, w2, b2)).astype(jnp.bfloat16)
    x = jnp.maximum(lin(x, w3, b3), 0.0)
    if norm:
        x = x / jnp.maximum(jnp.linalg.norm(x, axis=1, keepdims=True), 1e-12)
    return x


# ----------------------------------------------------------------------------
if __name__ == "__main__":
    # Small config consistent with the module (real defaults: latent=class=200,
    # hidden=feat=2048; scaled down for the demo — the kernel tiles to any size).
    latent_dim, class_dim, hidden_dim, feat_dim, bs = 32, 32, 256, 512, 16
    in_dim = latent_dim + class_dim

    key = jax.random.PRNGKey(0)
    ks = jax.random.split(key, 6)

    # weights_init: Linear weight ~ N(0, 0.02), bias = 0 (PyTorch layout (out, in))
    torch_params = [
        (0.02 * jax.random.normal(ks[0], (hidden_dim, in_dim), jnp.float32),
         jnp.zeros((hidden_dim,), jnp.float32)),
        (0.02 * jax.random.normal(ks[1], (hidden_dim, hidden_dim), jnp.float32),
         jnp.zeros((hidden_dim,), jnp.float32)),
        (0.02 * jax.random.normal(ks[2], (feat_dim, hidden_dim), jnp.float32),
         jnp.zeros((feat_dim,), jnp.float32)),
    ]
    params = prepare_params(torch_params)

    z = jax.random.normal(ks[3], (bs, latent_dim), jnp.float32)
    label = jax.nn.one_hot(
        jax.random.randint(ks[4], (bs,), 0, class_dim), class_dim, dtype=jnp.float32)

    img = jax.block_until_ready(
        generator_forward(z, label, params, feat_dim=feat_dim, norm=False))
    assert img.shape == (bs, feat_dim), img.shape
    assert bool(jnp.all(jnp.isfinite(img)))

    ref = jax.block_until_ready(reference_forward(z, label, torch_params))
    max_err = float(jnp.max(jnp.abs(img - ref)))
    assert max_err < 5e-3, f"mismatch vs reference: {max_err}"

    print("KERNEL_OK")
</pallas_src>

<mosaic_0001>
module attributes {stable_mosaic.version = 11 : i64} {
  func.func @_linear_act_fullk_kernel(%arg0: i32, %arg1: i32, %arg2: memref<16x128xbf16, #tpu.memory_space<vmem>>, %arg3: memref<128x256xbf16, #tpu.memory_space<vmem>>, %arg4: memref<1x256xf32, #tpu.memory_space<vmem>>, %arg5: memref<16x256xbf16, #tpu.memory_space<vmem>>) attributes {dimension_semantics = [#tpu.dimension_semantics<parallel>, #tpu.dimension_semantics<parallel>], iteration_bounds = array<i64: 1, 1>, scalar_prefetch = 0 : i64, scratch_operands = 0 : i64, tpu.core_type = #tpu.core_type<tc>, window_params = [{transform_indices = @transform_0, window_bounds = array<i64: 16, 128>}, {transform_indices = @transform_1, window_bounds = array<i64: 128, 256>}, {transform_indices = @transform_2, window_bounds = array<i64: 1, 256>}, {transform_indices = @transform_3, window_bounds = array<i64: 16, 256>}]} {
    %c0 = arith.constant 0 : index
    %c0_0 = arith.constant 0 : index
    %0 = vector.load %arg2[%c0, %c0_0] : memref<16x128xbf16, #tpu.memory_space<vmem>>, vector<16x128xbf16>
    %c0_1 = arith.constant 0 : index
    %c0_2 = arith.constant 0 : index
    %1 = vector.load %arg3[%c0_1, %c0_2] : memref<128x256xbf16, #tpu.memory_space<vmem>>, vector<128x256xbf16>
    %cst = arith.constant dense<0.000000e+00> : vector<16x256xf32>
    %2 = tpu.matmul %0, %1, %cst {dimension_numbers = #tpu.dot_dimension_numbers<[1], [0], [0], [1], [0, 0, 1, 1], [], []>} : vector<16x128xbf16>, vector<128x256xbf16>, vector<16x256xf32> -> vector<16x256xf32>
    %c0_3 = arith.constant 0 : index
    %c0_4 = arith.constant 0 : index
    %3 = vector.load %arg4[%c0_3, %c0_4] : memref<1x256xf32, #tpu.memory_space<vmem>>, vector<1x256xf32>
    %4 = vector.broadcast %3 : vector<1x256xf32> to vector<16x256xf32>
    %5 = arith.addf %2, %4 : vector<16x256xf32>
    %cst_5 = arith.constant 2.000000e-01 : f32
    %6 = vector.broadcast %cst_5 : f32 to vector<16x256xf32>
    %7 = arith.mulf %6, %5 : vector<16x256xf32>
    %8 = arith.maximumf %5, %7 : vector<16x256xf32>
    %9 = arith.truncf %8 : vector<16x256xf32> to vector<16x256xbf16>
    %c0_6 = arith.constant 0 : index
    %c0_7 = arith.constant 0 : index
    %10 = vector.load %arg5[%c0_6, %c0_7] : memref<16x256xbf16, #tpu.memory_space<vmem>>, vector<16x256xbf16>
    tpu.vector_store %arg5[%c0_6, %c0_7], %9 {strides = array<i32>} : memref<16x256xbf16, #tpu.memory_space<vmem>>, vector<16x256xbf16>,
    return
  }
  func.func @transform_0(%arg0: i32, %arg1: i32) -> (i32, i32) {
    %c0_i32 = arith.constant 0 : i32
    %c0_i32_0 = arith.constant 0 : i32
    return %arg0, %c0_i32 : i32, i32
  }
  func.func @transform_1(%arg0: i32, %arg1: i32) -> (i32, i32) {
    %c0_i32 = arith.constant 0 : i32
    %c0_i32_0 = arith.constant 0 : i32
    return %c0_i32, %arg1 : i32, i32
  }
  func.func @transform_2(%arg0: i32, %arg1: i32) -> (i32, i32) {
    %c0_i32 = arith.constant 0 : i32
    %c0_i32_0 = arith.constant 0 : i32
    return %c0_i32, %arg1 : i32, i32
  }
  func.func @transform_3(%arg0: i32, %arg1: i32) -> (i32, i32) {
    %c0_i32 = arith.constant 0 : i32
    return %arg0, %arg1 : i32, i32
  }
}

module attributes {stable_mosaic.version = 11 : i64} {
  func.func @_linear_act_fullk_kernel(%arg0: i32, %arg1: i32, %arg2: memref<16x256xbf16, #tpu.memory_space<vmem>>, %arg3: memref<256x256xbf16, #tpu.memory_space<vmem>>, %arg4: memref<1x256xf32, #tpu.memory_space<vmem>>, %arg5: memref<16x256xbf16, #tpu.memory_space<vmem>>) attributes {dimension_semantics = [#tpu.dimension_semantics<parallel>, #tpu.dimension_semantics<parallel>], iteration_bounds = array<i64: 1, 1>, scalar_prefetch = 0 : i64, scratch_operands = 0 : i64, tpu.core_type = #tpu.core_type<tc>, window_params = [{transform_indices = @transform_0, window_bounds = array<i64: 16, 256>}, {transform_indices = @transform_1, window_bounds = array<i64: 256, 256>}, {transform_indices = @transform_2, window_bounds = array<i64: 1, 256>}, {transform_indices = @transform_3, window_bounds = array<i64: 16, 256>}]} {
    %c0 = arith.constant 0 : index
    %c0_0 = arith.constant 0 : index
    %0 = vector.load %arg2[%c0, %c0_0] : memref<16x256xbf16, #tpu.memory_space<vmem>>, vector<16x256xbf16>
    %c0_1 = arith.constant 0 : index
    %c0_2 = arith.constant 0 : index
    %1 = vector.load %arg3[%c0_1, %c0_2] : memref<256x256xbf16, #tpu.memory_space<vmem>>, vector<256x256xbf16>
    %cst = arith.constant dense<0.000000e+00> : vector<16x256xf32>
    %2 = tpu.matmul %0, %1, %cst {dimension_numbers = #tpu.dot_dimension_numbers<[1], [0], [0], [1], [0, 0, 1, 1], [], []>} : vector<16x256xbf16>, vector<256x256xbf16>, vector<16x256xf32> -> vector<16x256xf32>
    %c0_3 = arith.constant 0 : index
    %c0_4 = arith.constant 0 : index
    %3 = vector.load %arg4[%c0_3, %c0_4] : memref<1x256xf32, #tpu.memory_space<vmem>>, vector<1x256xf32>
    %4 = vector.broadcast %3 : vector<1x256xf32> to vector<16x256xf32>
    %5 = arith.addf %2, %4 : vector<16x256xf32>
    %cst_5 = arith.constant 2.000000e-01 : f32
    %6 = vector.broadcast %cst_5 : f32 to vector<16x256xf32>
    %7 = arith.mulf %6, %5 : vector<16x256xf32>
    %8 = arith.maximumf %5, %7 : vector<16x256xf32>
    %9 = arith.truncf %8 : vector<16x256xf32> to vector<16x256xbf16>
    %c0_6 = arith.constant 0 : index
    %c0_7 = arith.constant 0 : index
    %10 = vector.load %arg5[%c0_6, %c0_7] : memref<16x256xbf16, #tpu.memory_space<vmem>>, vector<16x256xbf16>
    tpu.vector_store %arg5[%c0_6, %c0_7], %9 {strides = array<i32>} : memref<16x256xbf16, #tpu.memory_space<vmem>>, vector<16x256xbf16>,
    return
  }
  func.func @transform_0(%arg0: i32, %arg1: i32) -> (i32, i32) {
    %c0_i32 = arith.constant 0 : i32
    %c0_i32_0 = arith.constant 0 : i32
    return %arg0, %c0_i32 : i32, i32
  }
  func.func @transform_1(%arg0: i32, %arg1: i32) -> (i32, i32) {
    %c0_i32 = arith.constant 0 : i32
    %c0_i32_0 = arith.constant 0 : i32
    return %c0_i32, %arg1 : i32, i32
  }
  func.func @transform_2(%arg0: i32, %arg1: i32) -> (i32, i32) {
    %c0_i32 = arith.constant 0 : i32
    %c0_i32_0 = arith.constant 0 : i32
    return %c0_i32, %arg1 : i32, i32
  }
  func.func @transform_3(%arg0: i32, %arg1: i32) -> (i32, i32) {
    %c0_i32 = arith.constant 0 : i32
    return %arg0, %arg1 : i32, i32
  }
}

module attributes {stable_mosaic.version = 11 : i64} {
  func.func @_linear_act_fullk_kernel(%arg0: i32, %arg1: i32, %arg2: memref<16x256xbf16, #tpu.memory_space<vmem>>, %arg3: memref<256x256xbf16, #tpu.memory_space<vmem>>, %arg4: memref<1x256xf32, #tpu.memory_space<vmem>>, %arg5: memref<16x256xf32, #tpu.memory_space<vmem>>) attributes {dimension_semantics = [#tpu.dimension_semantics<parallel>, #tpu.dimension_semantics<parallel>], iteration_bounds = array<i64: 1, 2>, scalar_prefetch = 0 : i64, scratch_operands = 0 : i64, tpu.core_type = #tpu.core_type<tc>, window_params = [{transform_indices = @transform_0, window_bounds = array<i64: 16, 256>}, {transform_indices = @transform_1, window_bounds = array<i64: 256, 256>}, {transform_indices = @transform_2, window_bounds = array<i64: 1, 256>}, {transform_indices = @transform_3, window_bounds = array<i64: 16, 256>}]} {
    %c0 = arith.constant 0 : index
    %c0_0 = arith.constant 0 : index
    %0 = vector.load %arg2[%c0, %c0_0] : memref<16x256xbf16, #tpu.memory_space<vmem>>, vector<16x256xbf16>
    %c0_1 = arith.constant 0 : index
    %c0_2 = arith.constant 0 : index
    %1 = vector.load %arg3[%c0_1, %c0_2] : memref<256x256xbf16, #tpu.memory_space<vmem>>, vector<256x256xbf16>
    %cst = arith.constant dense<0.000000e+00> : vector<16x256xf32>
    %2 = tpu.matmul %0, %1, %cst {dimension_numbers = #tpu.dot_dimension_numbers<[1], [0], [0], [1], [0, 0, 1, 1], [], []>} : vector<16x256xbf16>, vector<256x256xbf16>, vector<16x256xf32> -> vector<16x256xf32>
    %c0_3 = arith.constant 0 : index
    %c0_4 = arith.constant 0 : index
    %3 = vector.load %arg4[%c0_3, %c0_4] : memref<1x256xf32, #tpu.memory_space<vmem>>, vector<1x256xf32>
    %4 = vector.broadcast %3 : vector<1x256xf32> to vector<16x256xf32>
    %5 = arith.addf %2, %4 : vector<16x256xf32>
    %cst_5 = arith.constant 0.000000e+00 : f32
    %6 = vector.broadcast %cst_5 : f32 to vector<16x256xf32>
    %7 = arith.maximumf %5, %6 : vector<16x256xf32>
    %c0_6 = arith.constant 0 : index
    %c0_7 = arith.constant 0 : index
    %8 = vector.load %arg5[%c0_6, %c0_7] : memref<16x256xf32, #tpu.memory_space<vmem>>, vector<16x256xf32>
    tpu.vector_store %arg5[%c0_6, %c0_7], %7 {strides = array<i32>} : memref<16x256xf32, #tpu.memory_space<vmem>>, vector<16x256xf32>,
    return
  }
  func.func @transform_0(%arg0: i32, %arg1: i32) -> (i32, i32) {
    %c0_i32 = arith.constant 0 : i32
    %c0_i32_0 = arith.constant 0 : i32
    return %arg0, %c0_i32 : i32, i32
  }
  func.func @transform_1(%arg0: i32, %arg1: i32) -> (i32, i32) {
    %c0_i32 = arith.constant 0 : i32
    %c0_i32_0 = arith.constant 0 : i32
    return %c0_i32, %arg1 : i32, i32
  }
  func.func @transform_2(%arg0: i32, %arg1: i32) -> (i32, i32) {
    %c0_i32 = arith.constant 0 : i32
    %c0_i32_0 = arith.constant 0 : i32
    return %c0_i32, %arg1 : i32, i32
  }
  func.func @transform_3(%arg0: i32, %arg1: i32) -> (i32, i32) {
    %c0_i32 = arith.constant 0 : i32
    return %arg0, %arg1 : i32, i32
  }
}

</mosaic_0001>

<bundles_post_ra>
// kernel: generator_forward.4
= control target key start
LH: loop header
LB: loop body
LE: loop exit
PB: predicated region body
PF: predicated region fallthrough
CT: control target
= control target key end

     0   :  { %8 = vsyncpa [#allocation3], 0  ;;  %s506_s0 = inlined_call_operand.vmem [shape: bf16[16,256], index: 0, kind: input, shape index: {}]   ;;  %s507_s1 = inlined_call_operand.hbm [shape: bf16[256,256], index: 1, kind: input, shape index: {}]   ;;  %s508_s2 = inlined_call_operand.hbm [shape: f32[1,256], index: 2, kind: input, shape index: {}]   ;;  %s509_s3 = inlined_call_operand.vmem [shape: bf16[16,256], index: 3, kind: output, shape index: {}]  }
   0x1   :  { %9 = vsyncpa [#allocation5], 0  ;;  %s464_s12 = smov [#allocation2]  }
   0x2   :  { %s17_s13 = sshll.u32 %s464_s12, 4  ;;  %s18_s13 = int_to_ptr.vmem [resolvable:$true] %s17_s13 }
   0x3   :  { %s428_s14 = scalar_lea.vmem %s18_s13, 4096  ;;  %p433_p1 = scmp.lt.s32.totalorder %s18_s13, %s18_s13 }
   0x4   :  { %p429_p0 = scmp.ne.s32.totalorder %s18_s13, %s428_s14  ;;  %p434_p2 = scmp.lt.s32.totalorder %s428_s14, %s428_s14 }
   0x6   :  { %p435_p3 = por %p434_p2, %p433_p1 }
   0x8   :  { %p436_p4 = pnand %p435_p3, %p429_p0 }
   0xa   :  { %439 = shalt.err (!%p436_p4)
}
   0xb   :  { %s465_s15 = smov 128   ;;  %s466_s16 = smov 8  }
   0xc   :  { %23 = dma.hbm_to_vmem [thread:$0]  %s507_s1, 4096, %s18_s13, [#allocation3], %s465_s15, %s465_s15, %s466_s16  }
   0xd   :  { %s467_s19 = smov [#allocation4]  }
   0xe   :  { %s30_s20 = sshll.u32 %s467_s19, 4  ;;  %s31_s20 = int_to_ptr.vmem [resolvable:$true] %s30_s20 }
   0xf   :  { %s448_s21 = scalar_lea.vmem %s31_s20, 32  ;;  %p453_p6 = scmp.lt.s32.totalorder %s31_s20, %s31_s20 }
  0x10   :  { %p449_p5 = scmp.ne.s32.totalorder %s31_s20, %s448_s21  ;;  %p454_p7 = scmp.lt.s32.totalorder %s448_s21, %s448_s21 }
  0x12   :  { %p455_p8 = por %p454_p7, %p453_p6 }
  0x14   :  { %p456_p9 = pnand %p455_p8, %p449_p5 }
  0x16   :  { %459 = shalt.err (!%p456_p9)
}
  0x17   :  { %33 = dma.hbm_to_vmem [thread:$0]  %s508_s2, 32, %s31_s20, [#allocation5]  }
  0x18   :  { %460 = dma.done.wait [#allocation3], 4096  }
  0x19   :  { %461 = vsyncadd [#allocation3], 4294963200 }
  0x1a   :  { %462 = dma.done.wait [#allocation5], 32  }
  0x1b   :  { %463 = vsyncadd [#allocation5], 4294967264  ;;  %v369_v0 = vld [vmem:[#allocation2 + $0x74] ss:$8 sps:$4 sm:$0xff]   ;;  %v371_v1 = vld [vmem:[#allocation2 + $0x70] ss:$8 sps:$4 sm:$0xff]   ;;  %v76_v34 = vlaneseq }
  0x1c   :  { %256 = vmatprep.subr.bf16.mxu0 %v369_v0  ;;  %v372_v2 = vld [vmem:[#allocation2 + $0x64] ss:$8 sps:$4 sm:$0xff]   ;;  %v374_v3 = vld [vmem:[#allocation2 + $0x60] ss:$8 sps:$4 sm:$0xff]   ;;  %v375_v4 = vld [vmem:[#allocation2 + $0x54] ss:$8 sps:$4 sm:$0xff]  }
  0x1d   :  { %257 = vmatpush1.bf16.msra.mxu0 %v371_v1  ;;  %v377_v5 = vld [vmem:[#allocation2 + $0x50] ss:$8 sps:$4 sm:$0xff]   ;;  %v378_v6 = vld [vmem:[#allocation2 + $0x44] ss:$8 sps:$4 sm:$0xff]   ;;  %v380_v7 = vld [vmem:[#allocation2 + $0x40] ss:$8 sps:$4 sm:$0xff]  }
  0x1e   :  { %258 = vmatprep.subr.bf16.mxu0 %v372_v2  ;;  %v381_v8 = vld [vmem:[#allocation2 + $0x34] ss:$8 sps:$4 sm:$0xff]   ;;  %v383_v9 = vld [vmem:[#allocation2 + $0x30] ss:$8 sps:$4 sm:$0xff]   ;;  %v384_v10 = vld [vmem:[#allocation2 + $0x24] ss:$8 sps:$4 sm:$0xff]  }
  0x1f   :  { %v386_v11 = vld [vmem:[#allocation2 + $0x20] ss:$8 sps:$4 sm:$0xff]   ;;  %v387_v12 = vld [vmem:[#allocation2 + $0x14] ss:$8 sps:$4 sm:$0xff]   ;;  %v419_v13 = vld [vmem:[%s506_s0 + $0x4] ss:$8 sps:$4 sm:$0xff]  }
  0x20   :  { %v389_v14 = vld [vmem:[#allocation2 + $0x10] ss:$8 sps:$4 sm:$0xff]   ;;  %v390_v15 = vld [vmem:[#allocation2 + $0x4] ss:$8 sps:$4 sm:$0xff]   ;;  %288 = vmatprep.mubr.bf16.mxu0 %v419_v13  ;;  %v392_v16 = vld [vmem:[#allocation2] ss:$8 sps:$4 sm:$0xff]  }
  0x21   :  { %259 = vmatpush1.bf16.msra.mxu0 %v374_v3  ;;  %v393_v17 = vld [vmem:[#allocation2 + $0xf4] ss:$8 sps:$4 sm:$0xff]   ;;  %v395_v18 = vld [vmem:[#allocation2 + $0xf0] ss:$8 sps:$4 sm:$0xff]   ;;  %v396_v19 = vld [vmem:[#allocation2 + $0xe4] ss:$8 sps:$4 sm:$0xff]  }
  0x22   :  { %260 = vmatprep.subr.bf16.mxu0 %v375_v4  ;;  %v398_v20 = vld [vmem:[#allocation2 + $0xe0] ss:$8 sps:$4 sm:$0xff]   ;;  %v399_v21 = vld [vmem:[#allocation2 + $0xd4] ss:$8 sps:$4 sm:$0xff]   ;;  %v401_v22 = vld [vmem:[#allocation2 + $0xd0] ss:$8 sps:$4 sm:$0xff]  }
  0x23   :  { %v402_v23 = vld [vmem:[#allocation2 + $0xc4] ss:$8 sps:$4 sm:$0xff]   ;;  %v404_v24 = vld [vmem:[#allocation2 + $0xc0] ss:$8 sps:$4 sm:$0xff]   ;;  %v405_v25 = vld [vmem:[#allocation2 + $0xb4] ss:$8 sps:$4 sm:$0xff]  }
  0x24   :  { %v407_v26 = vld [vmem:[#allocation2 + $0xb0] ss:$8 sps:$4 sm:$0xff]   ;;  %v408_v27 = vld [vmem:[#allocation2 + $0xa4] ss:$8 sps:$4 sm:$0xff]   ;;  %v410_v28 = vld [vmem:[#allocation2 + $0xa0] ss:$8 sps:$4 sm:$0xff]  }
  0x25   :  { %261 = vmatpush1.bf16.msra.mxu0 %v377_v5  ;;  %v411_v29 = vld [vmem:[#allocation2 + $0x94] ss:$8 sps:$4 sm:$0xff]   ;;  %v413_v30 = vld [vmem:[#allocation2 + $0x90] ss:$8 sps:$4 sm:$0xff]   ;;  %v414_v31 = vld [vmem:[#allocation2 + $0x84] ss:$8 sps:$4 sm:$0xff]  }
  0x26   :  { %262 = vmatprep.subr.bf16.mxu0 %v378_v6  ;;  %v416_v32 = vld [vmem:[#allocation2 + $0x80] ss:$8 sps:$4 sm:$0xff]   ;;  %v77_v35 = vshrl.u32 %v76_v34, 7 }
  0x27   :  { %v417_v33 = vld [vmem:[%s506_s0] ss:$8 sps:$4 sm:$0xff]  }
  0x28   :  { %v78_v36 = vsub.s32 0, %v77_v35  ;;  %v74_v37 = vld [vmem:[#allocation4] sm:$0x3]  ;;  %v82_v38 = vsub.s32 1, %v77_v35 }
  0x29   :  { %263 = vmatpush1.bf16.msra.mxu0 %v380_v7 }
  0x2a   :  { %264 = vmatprep.subr.bf16.mxu0 %v381_v8  ;;  %v79_v39 = vrot.slane %v74_v37, %v78_v36  ;;  %v83_v40 = vrot.slane %v74_v37, %v82_v38 }
  0x2d   :  { %265 = vmatpush1.bf16.msra.mxu0 %v383_v9 }
  0x2e   :  { %266 = vmatprep.subr.bf16.mxu0 %v384_v10 }
  0x31   :  { %267 = vmatpush1.bf16.msra.mxu0 %v386_v11 }
  0x32   :  { %268 = vmatprep.subr.bf16.mxu0 %v387_v12 }
  0x35   :  { %269 = vmatpush1.bf16.msra.mxu0 %v389_v14 }
  0x36   :  { %270 = vmatprep.subr.bf16.mxu0 %v390_v15 }
  0x39   :  { %271 = vmatpush1.bf16.msra.mxu0 %v392_v16 }
  0x3a   :  { %272 = vmatprep.subr.bf16.mxu0 %v393_v17 }
  0x3d   :  { %273 = vmatpush2.bf16.msra.mxu0 %v395_v18 }
  0x3e   :  { %274 = vmatprep.subr.bf16.mxu0 %v396_v19 }
  0x41   :  { %275 = vmatpush2.bf16.msra.mxu0 %v398_v20 }
  0x42   :  { %276 = vmatprep.subr.bf16.mxu0 %v399_v21 }
  0x45   :  { %277 = vmatpush2.bf16.msra.mxu0 %v401_v22 }
  0x46   :  { %278 = vmatprep.subr.bf16.mxu0 %v402_v23 }
  0x49   :  { %279 = vmatpush2.bf16.msra.mxu0 %v404_v24 }
  0x4a   :  { %280 = vmatprep.subr.bf16.mxu0 %v405_v25 }
  0x4d   :  { %281 = vmatpush2.bf16.msra.mxu0 %v407_v26 }
  0x4e   :  { %282 = vmatprep.subr.bf16.mxu0 %v408_v27 }
  0x51   :  { %283 = vmatpush2.bf16.msra.mxu0 %v410_v28 }
  0x52   :  { %284 = vmatprep.subr.bf16.mxu0 %v411_v29 }
  0x55   :  { %285 = vmatpush2.bf16.msra.mxu0 %v413_v30 }
  0x56   :  { %286 = vmatprep.subr.bf16.mxu0 %v414_v31 }
  0x59   :  { %287 = vmatpush2.bf16.msra.mxu0 %v416_v32 }
  0x5c   :  { %289 = vmatmul.mubr.bf16.vlgmr.msra.gmra.mxu0 %v417_v33 }
 0x11c   :  { %v290_v41 = vpop.f32.mrf.mxu0 }
 0x11d   :  { %v291_v42 = vadd.f32 %v290_v41, %v79_v39 }
 0x11e   :  { %v292_v43 = vpop.f32.mrf.mxu0 }
 0x11f   :  { %v299_v44 = vmul.f32 0.2, %v291_v42  ;;  %v293_v45 = vadd.f32 %v292_v43, %v83_v40 }
 0x120   :  { %v294_v46 = vpop.f32.mrf.mxu0 }
 0x121   :  { %v300_v47 = vmul.f32 0.2, %v293_v45  ;;  %v295_v48 = vadd.f32 %v294_v46, %v79_v39  ;;  %v303_v50 = vmax.f32 %v291_v42, %v299_v44 }
 0x122   :  { %v296_v49 = vpop.f32.mrf.mxu0 }
 0x123   :  { %v304_v51 = vmax.f32 %v293_v45, %v300_v47  ;;  %v301_v52 = vmul.f32 0.2, %v295_v48  ;;  %v297_v53 = vadd.f32 %v296_v49, %v83_v40 }
 0x125   :  { %v363_v54 = vpack.c.bf16 %v304_v51, %v303_v50  ;;  %v302_v55 = vmul.f32 0.2, %v297_v53  ;;  %v305_v56 = vmax.f32 %v295_v48, %v301_v52 }
 0x127   :  { %319 = vst [vmem:[%s509_s3] sm:$0xff] %v363_v54  ;;  %v306_v57 = vmax.f32 %v297_v53, %v302_v55 }
 0x129   :  { %v364_v58 = vpack.c.bf16 %v306_v57, %v305_v56 }
 0x12b   :  { %320 = vst [vmem:[%s509_s3 + $0x8] sm:$0xff] %v364_v58 }
 0x12c   :  { %325 = vsyncpa [#allocation3], 1 }
 0x12d   :  { %326 = vsyncpa [#allocation5], 1 }

// kernel: generator_forward.3
= control target key start
LH: loop header
LB: loop body
LE: loop exit
PB: predicated region body
PF: predicated region fallthrough
CT: control target
= control target key end

     0   :  { %8 = vsyncpa [#allocation3], 0  ;;  %s363_s0 = inlined_call_operand.vmem [shape: bf16[16,128], index: 0, kind: input, shape index: {}]   ;;  %s364_s1 = inlined_call_operand.hbm [shape: bf16[128,256], index: 1, kind: input, shape index: {}]   ;;  %s365_s2 = inlined_call_operand.hbm [shape: f32[1,256], index: 2, kind: input, shape index: {}]   ;;  %s366_s3 = inlined_call_operand.vmem [shape: bf16[16,256], index: 3, kind: output, shape index: {}]  }
   0x1   :  { %9 = vsyncpa [#allocation5], 0  ;;  %s323_s12 = smov [#allocation2]  }
   0x2   :  { %s17_s13 = sshll.u32 %s323_s12, 4  ;;  %s18_s13 = int_to_ptr.vmem [resolvable:$true] %s17_s13 }
   0x3   :  { %s287_s14 = scalar_lea.vmem %s18_s13, 2048  ;;  %p292_p1 = scmp.lt.s32.totalorder %s18_s13, %s18_s13 }
   0x4   :  { %p288_p0 = scmp.ne.s32.totalorder %s18_s13, %s287_s14  ;;  %p293_p2 = scmp.lt.s32.totalorder %s287_s14, %s287_s14 }
   0x6   :  { %p294_p3 = por %p293_p2, %p292_p1 }
   0x8   :  { %p295_p4 = pnand %p294_p3, %p288_p0 }
   0xa   :  { %298 = shalt.err (!%p295_p4)
}
   0xb   :  { %s324_s15 = smov 128   ;;  %s325_s16 = smov 8  }
   0xc   :  { %23 = dma.hbm_to_vmem [thread:$0]  %s364_s1, 2048, %s18_s13, [#allocation3], %s324_s15, %s324_s15, %s325_s16  }
   0xd   :  { %s326_s19 = smov [#allocation4]  }
   0xe   :  { %s30_s20 = sshll.u32 %s326_s19, 4  ;;  %s31_s20 = int_to_ptr.vmem [resolvable:$true] %s30_s20 }
   0xf   :  { %s307_s21 = scalar_lea.vmem %s31_s20, 32  ;;  %p312_p6 = scmp.lt.s32.totalorder %s31_s20, %s31_s20 }
  0x10   :  { %p308_p5 = scmp.ne.s32.totalorder %s31_s20, %s307_s21  ;;  %p313_p7 = scmp.lt.s32.totalorder %s307_s21, %s307_s21 }
  0x12   :  { %p314_p8 = por %p313_p7, %p312_p6 }
  0x14   :  { %p315_p9 = pnand %p314_p8, %p308_p5 }
  0x16   :  { %318 = shalt.err (!%p315_p9)
}
  0x17   :  { %33 = dma.hbm_to_vmem [thread:$0]  %s365_s2, 32, %s31_s20, [#allocation5]  }
  0x18   :  { %319 = dma.done.wait [#allocation3], 2048  }
  0x19   :  { %320 = vsyncadd [#allocation3], 4294965248 }
  0x1a   :  { %321 = dma.done.wait [#allocation5], 32  }
  0x1b   :  { %322 = vsyncadd [#allocation5], 4294967264  ;;  %v327_v0 = vmov 0   ;;  %v254_v1 = vld [vmem:[#allocation2 + $0x74] ss:$8 sps:$4 sm:$0xff]   ;;  %v278_v17 = vld [vmem:[%s363_s0] sm:$0xff]   ;;  %v61_v18 = vlaneseq }
  0x1c   :  { %189 = vmatprep.mubr.bf16.mxu0 %v327_v0  ;;  %v256_v2 = vld [vmem:[#allocation2 + $0x70] ss:$8 sps:$4 sm:$0xff]   ;;  %157 = vmatprep.subr.bf16.mxu0 %v254_v1  ;;  %v257_v3 = vld [vmem:[#allocation2 + $0x64] ss:$8 sps:$4 sm:$0xff]   ;;  %v259_v4 = vld [vmem:[#allocation2 + $0x60] ss:$8 sps:$4 sm:$0xff]  }
  0x1d   :  { %158 = vmatpush1.bf16.msra.mxu0 %v256_v2  ;;  %v260_v5 = vld [vmem:[#allocation2 + $0x54] ss:$8 sps:$4 sm:$0xff]   ;;  %v262_v6 = vld [vmem:[#allocation2 + $0x50] ss:$8 sps:$4 sm:$0xff]   ;;  %v263_v7 = vld [vmem:[#allocation2 + $0x44] ss:$8 sps:$4 sm:$0xff]  }
  0x1e   :  { %159 = vmatprep.subr.bf16.mxu0 %v257_v3  ;;  %v265_v8 = vld [vmem:[#allocation2 + $0x40] ss:$8 sps:$4 sm:$0xff]   ;;  %v266_v9 = vld [vmem:[#allocation2 + $0x34] ss:$8 sps:$4 sm:$0xff]   ;;  %v268_v10 = vld [vmem:[#allocation2 + $0x30] ss:$8 sps:$4 sm:$0xff]  }
  0x1f   :  { %v269_v11 = vld [vmem:[#allocation2 + $0x24] ss:$8 sps:$4 sm:$0xff]   ;;  %v271_v12 = vld [vmem:[#allocation2 + $0x20] ss:$8 sps:$4 sm:$0xff]   ;;  %v272_v13 = vld [vmem:[#allocation2 + $0x14] ss:$8 sps:$4 sm:$0xff]  }
  0x20   :  { %v274_v14 = vld [vmem:[#allocation2 + $0x10] ss:$8 sps:$4 sm:$0xff]   ;;  %v275_v15 = vld [vmem:[#allocation2 + $0x4] ss:$8 sps:$4 sm:$0xff]   ;;  %v277_v16 = vld [vmem:[#allocation2] ss:$8 sps:$4 sm:$0xff]  }
  0x21   :  { %160 = vmatpush1.bf16.msra.mxu0 %v259_v4  ;;  %v62_v19 = vshrl.u32 %v61_v18, 7  ;;  %v59_v21 = vld [vmem:[#allocation4] sm:$0x3] }
  0x22   :  { %161 = vmatprep.subr.bf16.mxu0 %v260_v5 }
  0x23   :  { %v63_v20 = vsub.s32 0, %v62_v19  ;;  %v67_v22 = vsub.s32 1, %v62_v19 }
  0x25   :  { %162 = vmatpush1.bf16.msra.mxu0 %v262_v6  ;;  %v64_v23 = vrot.slane %v59_v21, %v63_v20  ;;  %v68_v24 = vrot.slane %v59_v21, %v67_v22 }
  0x26   :  { %163 = vmatprep.subr.bf16.mxu0 %v263_v7 }
  0x29   :  { %164 = vmatpush1.bf16.msra.mxu0 %v265_v8 }
  0x2a   :  { %165 = vmatprep.subr.bf16.mxu0 %v266_v9 }
  0x2d   :  { %166 = vmatpush1.bf16.msra.mxu0 %v268_v10 }
  0x2e   :  { %167 = vmatprep.subr.bf16.mxu0 %v269_v11 }
  0x31   :  { %168 = vmatpush1.bf16.msra.mxu0 %v271_v12 }
  0x32   :  { %169 = vmatprep.subr.bf16.mxu0 %v272_v13 }
  0x35   :  { %170 = vmatpush1.bf16.msra.mxu0 %v274_v14 }
  0x36   :  { %171 = vmatprep.subr.bf16.mxu0 %v275_v15 }
  0x39   :  { %172 = vmatpush1.bf16.msra.mxu0 %v277_v16 }
  0x3c   :  { %190 = vmatmul.mubr.bf16.vlgmr.msra.gmra.mxu0 %v278_v17 }
  0xfc   :  { %v191_v25 = vpop.f32.mrf.mxu0 }
  0xfd   :  { %v192_v26 = vadd.f32 %v191_v25, %v64_v23 }
  0xfe   :  { %v193_v27 = vpop.f32.mrf.mxu0 }
  0xff   :  { %v200_v28 = vmul.f32 0.2, %v192_v26  ;;  %v194_v29 = vadd.f32 %v193_v27, %v68_v24 }
 0x100   :  { %v195_v30 = vpop.f32.mrf.mxu0 }
 0x101   :  { %v201_v31 = vmul.f32 0.2, %v194_v29  ;;  %v196_v32 = vadd.f32 %v195_v30, %v64_v23  ;;  %v204_v34 = vmax.f32 %v192_v26, %v200_v28 }
 0x102   :  { %v197_v33 = vpop.f32.mrf.mxu0 }
 0x103   :  { %v205_v35 = vmax.f32 %v194_v29, %v201_v31  ;;  %v202_v36 = vmul.f32 0.2, %v196_v32  ;;  %v198_v37 = vadd.f32 %v197_v33, %v68_v24 }
 0x105   :  { %v247_v38 = vpack.c.bf16 %v205_v35, %v204_v34  ;;  %v203_v39 = vmul.f32 0.2, %v198_v37  ;;  %v206_v40 = vmax.f32 %v196_v32, %v202_v36 }
 0x107   :  { %220 = vst [vmem:[%s366_s3] sm:$0xff] %v247_v38  ;;  %v207_v41 = vmax.f32 %v198_v37, %v203_v39 }
 0x109   :  { %v248_v42 = vpack.c.bf16 %v207_v41, %v206_v40 }
 0x10b   :  { %221 = vst [vmem:[%s366_s3 + $0x8] sm:$0xff] %v248_v42 }
 0x10c   :  { %226 = vsyncpa [#allocation3], 1 }
 0x10d   :  { %227 = vsyncpa [#allocation5], 1 }

// kernel: generator_forward.5
= control target key start
LH: loop header
LB: loop body
LE: loop exit
PB: predicated region body
PF: predicated region fallthrough
CT: control target
= control target key end

     0   :  { %8 = vsyncpa [#allocation4], 0  ;;  %s1276_s0 = inlined_call_operand.vmem [shape: bf16[16,256], index: 0, kind: input, shape index: {}]   ;;  %s1277_s1 = inlined_call_operand.vmem [shape: bf16[256,512], index: 1, kind: input, shape index: {}]   ;;  %s1278_s2 = inlined_call_operand.vmem [shape: f32[1,512], index: 2, kind: input, shape index: {}]   ;;  %s1279_s3 = inlined_call_operand.hbm [shape: f32[16,512], index: 3, kind: output, shape index: {}]  }
   0x1   :  { %10 = vsyncpa [#allocation4 + $0x1], 0  ;;  %s1041_s12 = smov 0   ;;  %s1043_s13 = smov 0  }
   0x2   :  { %s1045_s14 = smov 0   ;;  %s1047_s15 = smov 0  }
   0x3   :  { %s1049_s16 = smov 0   ;;  %s1051_s17 = smov 0  }
   0x4 LB: > { %s777_s18 = sadd.s32 4294967295, %s1015_s17   ;;  %s778_s19 = sadd.s32 4294967294, %s1015_s17   ;;  %s1015_s17 = sphi %s1051_s17, %s16_s17   ;;  %s1011_s16 = sphi %s1049_s16, %s1286_s16   ;;  %s1007_s15 = sphi %s1047_s15, %s1285_s15   ;;  %s1003_s14 = sphi %s1045_s14, %s1284_s14   ;;  %s999_s13 = sphi %s1043_s13, %s1283_s13   ;;  %s995_s12 = sphi %s1041_s12, %s1282_s12  }
   0x5   : > { %s25_s20 = sadd.s32 1, %s1011_s16  ;;  %s61_s21 = sadd.s32 1, %s1003_s14 }
   0x6   : > { %p26_p0 = scmp.ge.s32.totalorder %s25_s20, 2  ;;  %p68_p1 = scmp.ne.s32.totalorder %s1003_s14, %s999_s13 }
   0x7   : > { %p69_p2 = scmp.eq.s32.totalorder %s1015_s17, 0  ;;  %p126_p3 = scmp.eq.s32.totalorder %s777_s18, 1 }
   0x8   : > { %s1288_s20 = smov (%p26_p0, %s25_s20), 0  ;;  %p131_p6 = scmp.ne.s32.totalorder %s999_s13, %s995_s12 }
   0x9   : > { %p70_p4 = por %p69_p2, %p68_p1  ;;  %p1080_p5 = por %p126_p3, %p68_p1 }
   0xa   : > { %s58_s23 = ssub.s32 %s1011_s16, %s1288_s20  ;;  %p132_p8 = scmp.eq.s32.totalorder %s778_s19, 1 }
   0xb   : > { %p59_p7 = scmp.eq.s32.totalorder %s58_s23, 0  ;;  %p781_p10 = scmp.ge.s32.totalorder %s1015_s17, 2 }
   0xc   : > { %p1091_p9 = por %p132_p8, %p131_p6 }
   0xd   : > { %s1089_s24 = scalar_select %p59_p7, %s1003_s14, %s61_s21  }
   0xe   : > { %158 = sbr.rel (%p781_p10) target bundleno = 39 (0x27), region = 20 }
  0x13   : > { %161 = sbr.rel (!%p70_p4) target bundleno = 39 (0x27), region = 24  ;;  %s163_s26 = sand.u32 (%p70_p4), 1, %s1003_s14  }
  0x14   : > { %s828_s27 = sshll.u32 (%p70_p4), %s1011_s16, 3  ;;  %s782_s28 = sshll.u32 (%p70_p4), %s163_s26, 8 }
  0x15   : > { %s1103_s4 = scalar_lea.vmem (%p70_p4), %s1277_s1, %s828_s27  ;;  %s1108_s5 = scalar_lea.vmem (%p70_p4), [#allocation2], %s782_s28 }
  0x16   : > { %v259_v0 = vld [vmem:[%s1103_s4] sm:$0xff] (%p70_p4)  ;;  %v261_v1 = vld [vmem:[%s1103_s4 + $0x10] sm:$0xff] (%p70_p4) }
  0x17   : > { %v263_v2 = vld [vmem:[%s1103_s4 + $0x20] sm:$0xff] (%p70_p4)  ;;  %260 = vst [vmem:[%s1108_s5] sm:$0xff] (%p70_p4), %v259_v0  ;;  %262 = vst [vmem:[%s1108_s5 + $0x8] sm:$0xff] (%p70_p4), %v261_v1  ;;  %v265_v3 = vld [vmem:[%s1103_s4 + $0x30] sm:$0xff] (%p70_p4) }
  0x18   : > { %264 = vst [vmem:[%s1108_s5 + $0x10] sm:$0xff] %v263_v2  ;;  %v267_v4 = vld [vmem:[%s1103_s4 + $0x40] sm:$0xff]  ;;  %v269_v5 = vld [vmem:[%s1103_s4 + $0x50] sm:$0xff]  ;;  %266 = vst [vmem:[%s1108_s5 + $0x18] sm:$0xff] %v265_v3 }
  0x19   : > { %268 = vst [vmem:[%s1108_s5 + $0x20] sm:$0xff] %v267_v4  ;;  %270 = vst [vmem:[%s1108_s5 + $0x28] sm:$0xff] %v269_v5  ;;  %v271_v6 = vld [vmem:[%s1103_s4 + $0x60] sm:$0xff]  ;;  %v273_v7 = vld [vmem:[%s1103_s4 + $0x70] sm:$0xff] }
  0x1a   : > { %v275_v8 = vld [vmem:[%s1103_s4 + $0x80] sm:$0xff]  ;;  %272 = vst [vmem:[%s1108_s5 + $0x30] sm:$0xff] %v271_v6  ;;  %274 = vst [vmem:[%s1108_s5 + $0x38] sm:$0xff] %v273_v7  ;;  %v277_v9 = vld [vmem:[%s1103_s4 + $0x90] sm:$0xff] }
  0x1b   : > { %276 = vst [vmem:[%s1108_s5 + $0x40] sm:$0xff] %v275_v8  ;;  %v279_v10 = vld [vmem:[%s1103_s4 + $0xa0] sm:$0xff]  ;;  %v281_v11 = vld [vmem:[%s1103_s4 + $0xb0] sm:$0xff]  ;;  %278 = vst [vmem:[%s1108_s5 + $0x48] sm:$0xff] %v277_v9 }
  0x1c   : > { %280 = vst [vmem:[%s1108_s5 + $0x50] sm:$0xff] %v279_v10  ;;  %282 = vst [vmem:[%s1108_s5 + $0x58] sm:$0xff] %v281_v11  ;;  %v283_v12 = vld [vmem:[%s1103_s4 + $0xc0] sm:$0xff]  ;;  %v285_v13 = vld [vmem:[%s1103_s4 + $0xd0] sm:$0xff] }
  0x1d   : > { %v287_v14 = vld [vmem:[%s1103_s4 + $0xe0] sm:$0xff]  ;;  %284 = vst [vmem:[%s1108_s5 + $0x60] sm:$0xff] %v283_v12  ;;  %286 = vst [vmem:[%s1108_s5 + $0x68] sm:$0xff] %v285_v13  ;;  %v289_v15 = vld [vmem:[%s1103_s4 + $0xf0] sm:$0xff] }
  0x1e   : > { %288 = vst [vmem:[%s1108_s5 + $0x70] sm:$0xff] %v287_v14  ;;  %v291_v16 = vld [vmem:[%s1103_s4 + $0x100] sm:$0xff]  ;;  %v293_v17 = vld [vmem:[%s1103_s4 + $0x110] sm:$0xff]  ;;  %290 = vst [vmem:[%s1108_s5 + $0x78] sm:$0xff] %v289_v15 }
  0x1f   : > { %292 = vst [vmem:[%s1108_s5 + $0x80] sm:$0xff] %v291_v16  ;;  %294 = vst [vmem:[%s1108_s5 + $0x88] sm:$0xff] %v293_v17  ;;  %v295_v18 = vld [vmem:[%s1103_s4 + $0x120] sm:$0xff]  ;;  %v297_v19 = vld [vmem:[%s1103_s4 + $0x130] sm:$0xff] }
  0x20   : > { %v299_v20 = vld [vmem:[%s1103_s4 + $0x140] sm:$0xff]  ;;  %296 = vst [vmem:[%s1108_s5 + $0x90] sm:$0xff] %v295_v18  ;;  %298 = vst [vmem:[%s1108_s5 + $0x98] sm:$0xff] %v297_v19  ;;  %v301_v21 = vld [vmem:[%s1103_s4 + $0x150] sm:$0xff] }
  0x21   : > { %300 = vst [vmem:[%s1108_s5 + $0xa0] sm:$0xff] %v299_v20  ;;  %v303_v22 = vld [vmem:[%s1103_s4 + $0x160] sm:$0xff]  ;;  %v305_v23 = vld [vmem:[%s1103_s4 + $0x170] sm:$0xff]  ;;  %302 = vst [vmem:[%s1108_s5 + $0xa8] sm:$0xff] %v301_v21 }
  0x22   : > { %304 = vst [vmem:[%s1108_s5 + $0xb0] sm:$0xff] %v303_v22  ;;  %306 = vst [vmem:[%s1108_s5 + $0xb8] sm:$0xff] %v305_v23  ;;  %v307_v24 = vld [vmem:[%s1103_s4 + $0x180] sm:$0xff]  ;;  %v309_v25 = vld [vmem:[%s1103_s4 + $0x190] sm:$0xff] }
  0x23   : > { %v311_v26 = vld [vmem:[%s1103_s4 + $0x1a0] sm:$0xff]  ;;  %308 = vst [vmem:[%s1108_s5 + $0xc0] sm:$0xff] %v307_v24  ;;  %310 = vst [vmem:[%s1108_s5 + $0xc8] sm:$0xff] %v309_v25  ;;  %v313_v27 = vld [vmem:[%s1103_s4 + $0x1b0] sm:$0xff] }
  0x24   : > { %312 = vst [vmem:[%s1108_s5 + $0xd0] sm:$0xff] %v311_v26  ;;  %v315_v28 = vld [vmem:[%s1103_s4 + $0x1c0] sm:$0xff]  ;;  %v317_v29 = vld [vmem:[%s1103_s4 + $0x1d0] sm:$0xff]  ;;  %314 = vst [vmem:[%s1108_s5 + $0xd8] sm:$0xff] %v313_v27 }
  0x25   : > { %316 = vst [vmem:[%s1108_s5 + $0xe0] sm:$0xff] %v315_v28  ;;  %318 = vst [vmem:[%s1108_s5 + $0xe8] sm:$0xff] %v317_v29  ;;  %v319_v30 = vld [vmem:[%s1103_s4 + $0x1e0] sm:$0xff]  ;;  %v321_v31 = vld [vmem:[%s1103_s4 + $0x1f0] sm:$0xff] }
  0x26   : > { %320 = vst [vmem:[%s1108_s5 + $0xf0] sm:$0xff] %v319_v30  ;;  %322 = vst [vmem:[%s1108_s5 + $0xf8] sm:$0xff] %v321_v31 }
  0x27 PF: > { %p785_p11 = scmp.ge.s32.totalorder %s1015_s17, 1  ;;  %p335_p12 = scmp.lt.s32.totalorder %s1015_s17, 3 }
  0x29   : > { %p336_p13 = pnand %p785_p11, %p335_p12 }
  0x2a   : > { %s1174_s6 = sand.u32 (!%p336_p13), 1, %s999_s13   ;;  %s788_s19 = sshll.u32 (!%p336_p13), %s1007_s15, 1 }
  0x2b   : > { %339 = sbr.rel (%p336_p13) target bundleno = 331 (0x14b), region = 66  ;;  %s786_s7 = sshll.u32 (!%p336_p13), %s1174_s6, 8 }
  0x2c   : > { %s1180_s10 = scalar_lea.vmem (!%p336_p13), [#allocation2], %s786_s7  ;;  %p384_p0 = scmp.lt.s32.totalorder (!%p336_p13), %s788_s19, 3 }
  0x2d   : > { %s787_s27 = sshll.u32 (!%p336_p13), %s1174_s6, 5  ;;  %s829_s30 = sshll.u32 (!%p336_p13), %s1007_s15, 8 }
  0x2e   : > { %s374_s28 = scalar_lea.vmem (!%p336_p13), [#allocation3], %s787_s27  ;;  %s1228_s7 = scalar_lea.hbm (!%p336_p13), %s1279_s3, %s829_s30 }
  0x2f   : > { %s674_s29 = sshll.u32 (!%p336_p13), %s374_s28, 4  ;;  %s658_s8 = scalar_lea.sflag (!%p336_p13), [#allocation4], %s1174_s6  ;;  %s1223_s29 = int_to_ptr.vmem [resolvable:$true] %s674_s29 }
  0x30   : > { %v938_v32 = vld [vmem:[%s1276_s0 + $0x4] ss:$8 sps:$4 sm:$0xff]   ;;  %v888_v33 = vld [vmem:[%s1180_s10 + $0x74] ss:$8 sps:$4 sm:$0xff]   ;;  %v890_v34 = vld [vmem:[%s1180_s10 + $0x70] ss:$8 sps:$4 sm:$0xff]   ;;  %v426_v2 = vlaneseq }
  0x31   : > { %638 = vmatprep.mubr.bf16.mxu0 %v938_v32  ;;  %606 = vmatprep.subr.bf16.mxu0 %v888_v33  ;;  %v891_v35 = vld [vmem:[%s1180_s10 + $0x64] ss:$8 sps:$4 sm:$0xff]   ;;  %v893_v36 = vld [vmem:[%s1180_s10 + $0x60] ss:$8 sps:$4 sm:$0xff]   ;;  %v894_v37 = vld [vmem:[%s1180_s10 + $0x54] ss:$8 sps:$4 sm:$0xff]  }
  0x32   : > { %607 = vmatpush1.bf16.msra.mxu0 %v890_v34  ;;  %v896_v38 = vld [vmem:[%s1180_s10 + $0x50] ss:$8 sps:$4 sm:$0xff]   ;;  %v897_v39 = vld [vmem:[%s1180_s10 + $0x44] ss:$8 sps:$4 sm:$0xff]   ;;  %v899_v40 = vld [vmem:[%s1180_s10 + $0x40] ss:$8 sps:$4 sm:$0xff]  }
  0x33   : > { %608 = vmatprep.subr.bf16.mxu0 %v891_v35  ;;  %v900_v41 = vld [vmem:[%s1180_s10 + $0x34] ss:$8 sps:$4 sm:$0xff]   ;;  %v902_v42 = vld [vmem:[%s1180_s10 + $0x30] ss:$8 sps:$4 sm:$0xff]   ;;  %v903_v43 = vld [vmem:[%s1180_s10 + $0x24] ss:$8 sps:$4 sm:$0xff]  }
  0x34   : > { %v905_v44 = vld [vmem:[%s1180_s10 + $0x20] ss:$8 sps:$4 sm:$0xff]   ;;  %v906_v45 = vld [vmem:[%s1180_s10 + $0x14] ss:$8 sps:$4 sm:$0xff]   ;;  %v908_v46 = vld [vmem:[%s1180_s10 + $0x10] ss:$8 sps:$4 sm:$0xff]  }
  0x35   : > { %v909_v47 = vld [vmem:[%s1180_s10 + $0x4] ss:$8 sps:$4 sm:$0xff]   ;;  %v911_v48 = vld [vmem:[%s1180_s10] ss:$8 sps:$4 sm:$0xff]   ;;  %v912_v49 = vld [vmem:[%s1180_s10 + $0xf4] ss:$8 sps:$4 sm:$0xff]  }
  0x36   : > { %609 = vmatpush1.bf16.msra.mxu0 %v893_v36  ;;  %v914_v50 = vld [vmem:[%s1180_s10 + $0xf0] ss:$8 sps:$4 sm:$0xff]   ;;  %v915_v51 = vld [vmem:[%s1180_s10 + $0xe4] ss:$8 sps:$4 sm:$0xff]   ;;  %v917_v52 = vld [vmem:[%s1180_s10 + $0xe0] ss:$8 sps:$4 sm:$0xff]  }
  0x37   : > { %610 = vmatprep.subr.bf16.mxu0 %v894_v37  ;;  %v918_v53 = vld [vmem:[%s1180_s10 + $0xd4] ss:$8 sps:$4 sm:$0xff]   ;;  %v920_v54 = vld [vmem:[%s1180_s10 + $0xd0] ss:$8 sps:$4 sm:$0xff]   ;;  %v921_v55 = vld [vmem:[%s1180_s10 + $0xc4] ss:$8 sps:$4 sm:$0xff]  }
  0x38   : > { %v923_v56 = vld [vmem:[%s1180_s10 + $0xc0] ss:$8 sps:$4 sm:$0xff]   ;;  %v924_v57 = vld [vmem:[%s1180_s10 + $0xb4] ss:$8 sps:$4 sm:$0xff]   ;;  %v926_v58 = vld [vmem:[%s1180_s10 + $0xb0] ss:$8 sps:$4 sm:$0xff]  }
  0x39   : > { %v927_v59 = vld [vmem:[%s1180_s10 + $0xa4] ss:$8 sps:$4 sm:$0xff]   ;;  %v929_v60 = vld [vmem:[%s1180_s10 + $0xa0] ss:$8 sps:$4 sm:$0xff]   ;;  %v930_v61 = vld [vmem:[%s1180_s10 + $0x94] ss:$8 sps:$4 sm:$0xff]  }
  0x3a   : > { %611 = vmatpush1.bf16.msra.mxu0 %v896_v38  ;;  %v932_v62 = vld [vmem:[%s1180_s10 + $0x90] ss:$8 sps:$4 sm:$0xff]   ;;  %v933_v63 = vld [vmem:[%s1180_s10 + $0x84] ss:$8 sps:$4 sm:$0xff]   ;;  %v935_v0 = vld [vmem:[%s1180_s10 + $0x80] ss:$8 sps:$4 sm:$0xff]  }
  0x3b   : > { %612 = vmatprep.subr.bf16.mxu0 %v897_v39  ;;  %v936_v1 = vld [vmem:[%s1276_s0] ss:$8 sps:$4 sm:$0xff]   ;;  %s1290_s19 = smov (!%p384_p0, %s788_s19), 3  ;;  %v427_v3 = vshrl.u32 %v426_v2, 7  ;;  %s939_s9 = scalar_lea.vmem %s1223_s29, 512 }
  0x3c   : > { %s386_s26 = scalar_lea.vmem %s1278_s2, %s1290_s19  ;;  %p940_p1 = scmp.ne.s32.totalorder %s1223_s29, %s939_s9 }
  0x3d   : > { %v428_v4 = vsub.s32 0, %v427_v3  ;;  %v424_v5 = vld [vmem:[%s386_s26] sm:$0x3]  ;;  %v432_v6 = vsub.s32 1, %v427_v3  ;;  %s1017_s15 = smov [#allocation3]  }
  0x3e   : > { %613 = vmatpush1.bf16.msra.mxu0 %v899_v40  ;;  %p941_p2 = pnand %p940_p1, %p1080_p5  ;;  %s943_s10 = sshll.u32 %s1017_s15, 4  ;;  %s944_s10 = int_to_ptr.vmem [resolvable:$false] %s943_s10 }
  0x3f   : > { %614 = vmatprep.subr.bf16.mxu0 %v900_v41  ;;  %v429_v7 = vrot.slane %v424_v5, %v428_v4  ;;  %v433_v8 = vrot.slane %v424_v5, %v432_v6  ;;  %s945_s11 = scalar_lea.vmem %s944_s10, 1024  ;;  %p946_p4 = scmp.lt.s32.totalorder %s1223_s29, %s944_s10 }
  0x40   : > { %p942_p3 = pneg %p941_p2  ;;  %p947_p6 = scmp.lt.s32.totalorder %s945_s11, %s939_s9 }
  0x42   : > { %615 = vmatpush1.bf16.msra.mxu0 %v902_v42  ;;  %p948_p7 = por %p947_p6, %p946_p4 }
  0x43   : > { %616 = vmatprep.subr.bf16.mxu0 %v903_v43 }
  0x44   : > { %p949_p8 = pnand %p948_p7, %p942_p3 }
  0x46   : > { %617 = vmatpush1.bf16.msra.mxu0 %v905_v44 }
  0x47   : > { %618 = vmatprep.subr.bf16.mxu0 %v906_v45 }
  0x4a   : > { %619 = vmatpush1.bf16.msra.mxu0 %v908_v46 }
  0x4b   : > { %620 = vmatprep.subr.bf16.mxu0 %v909_v47 }
  0x4e   : > { %621 = vmatpush1.bf16.msra.mxu0 %v911_v48 }
  0x4f   : > { %622 = vmatprep.subr.bf16.mxu0 %v912_v49 }
  0x52   : > { %623 = vmatpush2.bf16.msra.mxu0 %v914_v50 }
  0x53   : > { %624 = vmatprep.subr.bf16.mxu0 %v915_v51 }
  0x56   : > { %625 = vmatpush2.bf16.msra.mxu0 %v917_v52 }
  0x57   : > { %626 = vmatprep.subr.bf16.mxu0 %v918_v53 }
  0x5a   : > { %627 = vmatpush2.bf16.msra.mxu0 %v920_v54 }
  0x5b   : > { %628 = vmatprep.subr.bf16.mxu0 %v921_v55 }
  0x5e   : > { %629 = vmatpush2.bf16.msra.mxu0 %v923_v56 }
  0x5f   : > { %630 = vmatprep.subr.bf16.mxu0 %v924_v57 }
  0x62   : > { %631 = vmatpush2.bf16.msra.mxu0 %v926_v58 }
  0x63   : > { %632 = vmatprep.subr.bf16.mxu0 %v927_v59 }
  0x66   : > { %633 = vmatpush2.bf16.msra.mxu0 %v929_v60 }
  0x67   : > { %634 = vmatprep.subr.bf16.mxu0 %v930_v61 }
  0x6a   : > { %635 = vmatpush2.bf16.msra.mxu0 %v932_v62 }
  0x6b   : > { %636 = vmatprep.subr.bf16.mxu0 %v933_v63 }
  0x6e   : > { %637 = vmatpush2.bf16.msra.mxu0 %v935_v0 }
  0x71   : > { %639 = vmatmul.mubr.bf16.vlgmr.msra.gmra.mxu0 %v936_v1 }
 0x131   : > { %v640_v9 = vpop.f32.mrf.mxu0 }
 0x132   : > { %v641_v10 = vadd.f32 %v640_v9, %v429_v7 }
 0x133   : > { %v642_v11 = vpop.f32.mrf.mxu0 }
 0x134   : > { %v649_v12 = vmax.f32 %v641_v10, 0.0  ;;  %v643_v13 = vadd.f32 %v642_v11, %v433_v8 }
 0x135   : > { %v644_v14 = vpop.f32.mrf.mxu0 }
 0x136   : > { %653 = vst [vmem:[%s374_s28] sm:$0xff] %v649_v12  ;;  %v650_v15 = vmax.f32 %v643_v13, 0.0  ;;  %v645_v16 = vadd.f32 %v644_v14, %v429_v7 }
 0x137   : > { %v646_v17 = vpop.f32.mrf.mxu0 }
 0x138   : > { %654 = vst [vmem:[%s374_s28 + $0x8] sm:$0xff] %v650_v15  ;;  %v651_v18 = vmax.f32 %v645_v16, 0.0  ;;  %v647_v19 = vadd.f32 %v646_v17, %v433_v8 }
 0x13a   : > { %655 = vst [vmem:[%s374_s28 + $0x10] sm:$0xff] %v651_v18  ;;  %v652_v20 = vmax.f32 %v647_v19, 0.0 }
 0x13c   : > { %656 = vst [vmem:[%s374_s28 + $0x18] sm:$0xff] %v652_v20 }
 0x13d   : > { %952 = shalt.err (!%p949_p8)
}
 0x13e   : > { %s953_s18 = scalar_lea.hbm %s1228_s7, 512  ;;  %s957_s23 = scalar_lea.hbm %s1279_s3, 1024 }
 0x13f   : > { %p954_p11 = scmp.ne.s32.totalorder %s1228_s7, %s953_s18  ;;  %p958_p0 = scmp.lt.s32.totalorder %s1228_s7, %s1279_s3 }
 0x140   : > { %p959_p1 = scmp.lt.s32.totalorder %s957_s23, %s953_s18 }
 0x141   : > { %p955_p12 = pnand %p954_p11, %p1080_p5 }
 0x142   : > { %p960_p2 = por %p959_p1, %p958_p0 }
 0x143   : > { %p956_p13 = pneg %p955_p12 }
 0x145   : > { %p961_p3 = pnand %p960_p2, %p956_p13 }
 0x147   : > { %964 = shalt.err (!%p961_p3)
}
 0x148   : > { %s1018_s28 = smov 256   ;;  %s1019_s30 = smov 512  }
 0x149   : > { %s1020_s4 = smov 16  }
 0x14a   : > { %830 = dma.vmem_to_hbm [thread:$0]  (%p1080_p5), %s1223_s29, 512, %s1228_s7, %s658_s8, %s1018_s28, %s1019_s30, %s1020_s4  }
 0x14b PF: > { %s689_s5 = sand.u32 1, %s995_s12   ;;  %p833_p4 = pnand %p781_p10, %p1091_p9 }
 0x14c   : > { %s690_s9 = scalar_lea.sflag [#allocation4], %s689_s5 }
 0x14d   : > { %p834_p6 = pneg %p833_p4 }
 0x14f   : > { %990 = dma.done.wait (%p834_p6), %s690_s9, 512  }
 0x150   : > { %992 = vsyncadd (%p834_p6), %s690_s9, 4294966784  ;;  %s16_s17 = sadd.s32 1, %s1015_s17   ;;  %s1282_s12 = smov %s999_s13 }
 0x151   : > { %p13_p7 = scmp.ge.s32.totalorder %s16_s17, 4   ;;  %s1283_s13 = smov %s1003_s14 }
 0x152   : > { %s1284_s14 = smov %s1089_s24  ;;  %s1285_s15 = smov %s1011_s16 }
 0x153   : > { %s1286_s16 = smov %s1288_s20  ;;  %15 = sbr.rel (!%p13_p7) target bundleno = 4 (0x4), region = 116 }
 0x158   :  { %695 = vsyncpa [#allocation4], 1 }
 0x159   :  { %697 = vsyncpa [#allocation4 + $0x1], 1 }

</bundles_post_ra>
